<compile_context>
chip_gen: v7x
topology: tpu7x:2x2x1
jax: 0.10.0
libtpu: 0.0.40
codegen_flags: <defaults>
</compile_context>

<pallas_src>
import jax
import jax.numpy as jnp
import numpy as np
from jax.experimental import pallas as pl
from jax.experimental.pallas import tpu as pltpu

_LANES = 128
_MAX_BLOCK_ROWS = 512  # (512, 128) f32 block = 256 KiB per operand


def _carry_kernel(x_ref, state_ref, out_ref, new_state_ref):
    # TODO(synk): concrete decoder compute (RNN cell, attention, output
    # projection, ...) is defined only in Decoder subclasses; the base class
    # specifies no math, so this kernel is a pure lane-dense carrier.
    out_ref[...] = x_ref[...]
    # State is one vreg tile; writing it every grid step keeps every core's
    # resident output block valid (idempotent, identical writes).
    new_state_ref[...] = state_ref[...]


def _pick_block_rows(rows):
    """Largest pipelined row-block <= _MAX_BLOCK_ROWS that divides `rows`."""
    if rows <= _MAX_BLOCK_ROWS:
        return rows
    for cand in (512, 256, 128, 64, 32, 16, 8):
        if rows % cand == 0:
            return cand
    return rows  # fall back to a single whole-array block (still correct)


def _lane_dense_2d(x):
    """Row-major flatten to (rows, 128) when possible, else a 2-D fallback."""
    n = x.size
    if n % _LANES == 0 and n >= _LANES:
        return x.reshape(n // _LANES, _LANES)
    return x.reshape(1, n)


class PallasDecoder:
    """JAX/Pallas counterpart of the abstract PyTorch Decoder interface."""

    def init_state(self, enc_outputs, *args):
        # Base-class init_state defines no computation: hand the encoder
        # outputs through untouched.  No kernel launch, no HBM traffic.
        return enc_outputs

    def forward(self, X, state):
        x2d = _lane_dense_2d(X)
        rows, lanes = x2d.shape
        block_rows = _pick_block_rows(rows)
        grid = (rows // block_rows,)

        state_ndim = state.ndim

        out2d, new_state = pl.pallas_call(
            _carry_kernel,
            out_shape=(
                jax.ShapeDtypeStruct(x2d.shape, x2d.dtype),
                jax.ShapeDtypeStruct(state.shape, state.dtype),
            ),
            grid=grid,
            in_specs=[
                pl.BlockSpec((block_rows, lanes), lambda i: (i, 0)),
                pl.BlockSpec(state.shape, lambda i: (0,) * state_ndim),
            ],
            out_specs=(
                pl.BlockSpec((block_rows, lanes), lambda i: (i, 0)),
                pl.BlockSpec(state.shape, lambda i: (0,) * state_ndim),
            ),
            input_output_aliases={0: 0, 1: 1},
            compiler_params=pltpu.CompilerParams(
                dimension_semantics=("parallel",),
            ),
        )(x2d, state)

        return out2d.reshape(X.shape), new_state

    __call__ = forward


if __name__ == "__main__":
    key = jax.random.PRNGKey(0)
    k1, k2 = jax.random.split(key)

    B, T, H = 2, 8, 32
    X = jax.random.normal(k1, (B, T, H), dtype=jnp.float32)
    enc_outputs = jax.random.normal(k2, (B, H), dtype=jnp.float32)

    # Host-side snapshots so the correctness check is independent of any
    # buffer aliasing/donation the kernel performs.
    X_host = np.asarray(X)
    enc_host = np.asarray(enc_outputs)

    dec = PallasDecoder()
    state = dec.init_state(enc_outputs)
    out, new_state = dec(X, state)

    out = jax.block_until_ready(out)
    new_state = jax.block_until_ready(new_state)

    # Sanity: the interface carrier must preserve X and state exactly.
    assert out.shape == (B, T, H) and new_state.shape == (B, H)
    assert np.allclose(np.asarray(out), X_host)
    assert np.allclose(np.asarray(new_state), enc_host)

    print("KERNEL_OK")
</pallas_src>

<mosaic_0001>
module attributes {stable_mosaic.version = 11 : i64} {
  func.func @_carry_kernel(%arg0: i32, %arg1: memref<4x128xf32, #tpu.memory_space<vmem>>, %arg2: memref<2x32xf32, #tpu.memory_space<vmem>>, %arg3: memref<4x128xf32, #tpu.memory_space<vmem>>, %arg4: memref<2x32xf32, #tpu.memory_space<vmem>>) attributes {dimension_semantics = [#tpu.dimension_semantics<parallel>], iteration_bounds = array<i64: 1>, scalar_prefetch = 0 : i64, scratch_operands = 0 : i64, tpu.core_type = #tpu.core_type<tc>, window_params = [{transform_indices = @transform_0, window_bounds = array<i64: 4, 128>}, {pipeline_mode = #tpu.pipeline_mode<synchronous>, transform_indices = @transform_1, window_bounds = array<i64: 2, 32>}, {transform_indices = @transform_2, window_bounds = array<i64: 4, 128>}, {pipeline_mode = #tpu.pipeline_mode<synchronous>, transform_indices = @transform_3, window_bounds = array<i64: 2, 32>}]} {
    %c0 = arith.constant 0 : index
    %c0_0 = arith.constant 0 : index
    %0 = vector.load %arg1[%c0, %c0_0] : memref<4x128xf32, #tpu.memory_space<vmem>>, vector<4x128xf32>
    %c0_1 = arith.constant 0 : index
    %c0_2 = arith.constant 0 : index
    %1 = vector.load %arg3[%c0_1, %c0_2] : memref<4x128xf32, #tpu.memory_space<vmem>>, vector<4x128xf32>
    tpu.vector_store %arg3[%c0_1, %c0_2], %0 {strides = array<i32>} : memref<4x128xf32, #tpu.memory_space<vmem>>, vector<4x128xf32>,
    %c0_3 = arith.constant 0 : index
    %c0_4 = arith.constant 0 : index
    %2 = vector.load %arg2[%c0_3, %c0_4] : memref<2x32xf32, #tpu.memory_space<vmem>>, vector<2x32xf32>
    %c0_5 = arith.constant 0 : index
    %c0_6 = arith.constant 0 : index
    %3 = vector.load %arg4[%c0_5, %c0_6] : memref<2x32xf32, #tpu.memory_space<vmem>>, vector<2x32xf32>
    tpu.vector_store %arg4[%c0_5, %c0_6], %2 {strides = array<i32>} : memref<2x32xf32, #tpu.memory_space<vmem>>, vector<2x32xf32>,
    return
  }
  func.func @transform_0(%arg0: i32) -> (i32, i32) {
    %c0_i32 = arith.constant 0 : i32
    %c0_i32_0 = arith.constant 0 : i32
    return %arg0, %c0_i32 : i32, i32
  }
  func.func @transform_1(%arg0: i32) -> (i32, i32) {
    %c0_i32 = arith.constant 0 : i32
    %c0_i32_0 = arith.constant 0 : i32
    %c0_i32_1 = arith.constant 0 : i32
    return %c0_i32, %c0_i32_0 : i32, i32
  }
  func.func @transform_2(%arg0: i32) -> (i32, i32) {
    %c0_i32 = arith.constant 0 : i32
    %c0_i32_0 = arith.constant 0 : i32
    return %arg0, %c0_i32 : i32, i32
  }
  func.func @transform_3(%arg0: i32) -> (i32, i32) {
    %c0_i32 = arith.constant 0 : i32
    %c0_i32_0 = arith.constant 0 : i32
    %c0_i32_1 = arith.constant 0 : i32
    return %c0_i32, %c0_i32_0 : i32, i32
  }
}

</mosaic_0001>

<bundles_post_ra>
// kernel: tpu_custom_call.1
= control target key start
LH: loop header
LB: loop body
LE: loop exit
PB: predicated region body
PF: predicated region fallthrough
CT: control target
= control target key end

     0   :  { %9 = vsyncpa [#allocation3], 0  ;;  %s246_s0 = inlined_call_operand.hbm [shape: f32[4,128], index: 0, kind: input, shape index: {}, may-alias: {0,2}]   ;;  %s247_s1 = inlined_call_operand.hbm [shape: f32[2,32], index: 1, kind: input, shape index: {}, may-alias: {1,3}]   ;;  %s248_s2 = inlined_call_operand.hbm [shape: f32[4,128], index: 2, kind: output, shape index: {0}, may-alias: {0,2}]   ;;  %s249_s3 = inlined_call_operand.hbm [shape: f32[2,32], index: 3, kind: output, shape index: {1}, may-alias: {1,3}]  }
   0x1   :  { %10 = vsyncpa [#allocation6], 0 }
   0x2   :  { %11 = vsyncpa [#allocation4], 0 }
   0x3   :  { %12 = vsyncpa [#allocation9], 0  ;;  %s174_s12 = smov [#allocation2]   ;;  %s175_s14 = smov [#allocation5]  }
   0x4   :  { %s19_s13 = sshll.u32 %s174_s12, 4  ;;  %s29_s15 = sshll.u32 %s175_s14, 4  ;;  %s20_s13 = int_to_ptr.vmem [resolvable:$true] %s19_s13  ;;  %s30_s15 = int_to_ptr.vmem [resolvable:$true] %s29_s15 }
   0x5   :  { %s78_s18 = scalar_lea.hbm %s246_s0, 64 }
   0x6   :  { %p79_p0 = scmp.ne.s32.totalorder %s246_s0, %s78_s18  ;;  %p82_p1 = scmp.lt.u32.totalorder %s78_s18, %s246_s0 }
   0x8   :  { %p84_p2 = pnand %p82_p1, %p79_p0 }
   0xa   :  { %87 = shalt.err (!%p84_p2)
}
   0xb   :  { %s88_s23 = scalar_lea.vmem %s20_s13, 64  ;;  %p93_p4 = scmp.lt.s32.totalorder %s20_s13, %s20_s13 }
   0xc   :  { %p89_p3 = scmp.ne.s32.totalorder %s20_s13, %s88_s23  ;;  %p94_p5 = scmp.lt.s32.totalorder %s88_s23, %s88_s23 }
   0xe   :  { %p95_p6 = por %p94_p5, %p93_p4 }
  0x10   :  { %p96_p7 = pnand %p95_p6, %p89_p3 }
  0x12   :  { %99 = shalt.err (!%p96_p7)
}
  0x13   :  { %22 = dma.hbm_to_vmem [thread:$0]  %s246_s0, 64, %s20_s13, [#allocation3]  }
  0x14   :  { %s100_s28 = scalar_lea.hbm %s247_s1, 32 }
  0x15   :  { %p101_p8 = scmp.ne.s32.totalorder %s247_s1, %s100_s28  ;;  %p104_p9 = scmp.lt.u32.totalorder %s100_s28, %s247_s1 }
  0x17   :  { %p106_p10 = pnand %p104_p9, %p101_p8 }
  0x19   :  { %109 = shalt.err (!%p106_p10)
}
  0x1a   :  { %s110_s6 = scalar_lea.vmem %s30_s15, 32  ;;  %p115_p12 = scmp.lt.s32.totalorder %s30_s15, %s30_s15 }
  0x1b   :  { %p111_p11 = scmp.ne.s32.totalorder %s30_s15, %s110_s6  ;;  %p116_p13 = scmp.lt.s32.totalorder %s110_s6, %s110_s6 }
  0x1d   :  { %p117_p0 = por %p116_p13, %p115_p12 }
  0x1f   :  { %p118_p1 = pnand %p117_p0, %p111_p11 }
  0x21   :  { %121 = shalt.err (!%p118_p1)
}
  0x22   :  { %32 = dma.hbm_to_vmem [thread:$0]  %s247_s1, 32, %s30_s15, [#allocation6]  }
  0x23   :  { %166 = dma.done.wait [#allocation3], 64  }
  0x24   :  { %167 = vsyncadd [#allocation3], 4294967232 }
  0x25   :  { %168 = dma.done.wait [#allocation6], 32  }
  0x26   :  { %169 = vsyncadd [#allocation6], 4294967264  ;;  %s176_s8 = smov [#allocation7]   ;;  %s177_s10 = smov [#allocation8]   ;;  %vm42_vm0 = vcmask 254976  }
  0x27   :  { %s50_s9 = sshll.u32 %s176_s8, 4  ;;  %s60_s11 = sshll.u32 %s177_s10, 4  ;;  %v39_v0 = vld [vmem:[#allocation2] sm:$0xf]  ;;  %v41_v1 = vld [vmem:[#allocation5] sm:$0x3]  ;;  %s51_s9 = int_to_ptr.vmem [resolvable:$true] %s50_s9  ;;  %s61_s11 = int_to_ptr.vmem [resolvable:$true] %s60_s11 }
  0x28   :  { %40 = vst [vmem:[#allocation7] sm:$0xf] %v39_v0  ;;  %43 = vst.msk [vmem:[#allocation8] sm:$0x3] %vm42_vm0, %v41_v1  ;;  %s122_s12 = scalar_lea.vmem %s51_s9, 64  ;;  %p127_p3 = scmp.lt.s32.totalorder %s51_s9, %s51_s9 }
  0x29   :  { %p123_p2 = scmp.ne.s32.totalorder %s51_s9, %s122_s12  ;;  %p128_p4 = scmp.lt.s32.totalorder %s122_s12, %s122_s12 }
  0x2b   :  { %p129_p5 = por %p128_p4, %p127_p3 }
  0x2d   :  { %p130_p6 = pnand %p129_p5, %p123_p2 }
  0x2f   :  { %133 = shalt.err (!%p130_p6)
}
  0x30   :  { %s134_s14 = scalar_lea.hbm %s248_s2, 64 }
  0x31   :  { %p135_p7 = scmp.ne.s32.totalorder %s248_s2, %s134_s14  ;;  %p138_p8 = scmp.lt.u32.totalorder %s134_s14, %s248_s2 }
  0x33   :  { %p140_p9 = pnand %p138_p8, %p135_p7 }
  0x35   :  { %143 = shalt.err (!%p140_p9)
}
  0x36   :  { %53 = dma.vmem_to_hbm [thread:$0]  %s51_s9, 64, %s248_s2, [#allocation4]  }
  0x37   :  { %s144_s21 = scalar_lea.vmem %s61_s11, 32  ;;  %p149_p11 = scmp.lt.s32.totalorder %s61_s11, %s61_s11 }
  0x38   :  { %p145_p10 = scmp.ne.s32.totalorder %s61_s11, %s144_s21  ;;  %p150_p12 = scmp.lt.s32.totalorder %s144_s21, %s144_s21 }
  0x3a   :  { %p151_p13 = por %p150_p12, %p149_p11 }
  0x3c   :  { %p152_p0 = pnand %p151_p13, %p145_p10 }
  0x3e   :  { %155 = shalt.err (!%p152_p0)
}
  0x3f   :  { %s156_s24 = scalar_lea.hbm %s249_s3, 32 }
  0x40   :  { %p157_p1 = scmp.ne.s32.totalorder %s249_s3, %s156_s24  ;;  %p160_p2 = scmp.lt.u32.totalorder %s156_s24, %s249_s3 }
  0x42   :  { %p162_p3 = pnand %p160_p2, %p157_p1 }
  0x44   :  { %165 = shalt.err (!%p162_p3)
}
  0x45   :  { %63 = dma.vmem_to_hbm [thread:$0]  %s61_s11, 32, %s249_s3, [#allocation9]  }
  0x46   :  { %170 = dma.done.wait [#allocation4], 64  }
  0x47   :  { %171 = vsyncadd [#allocation4], 4294967232 }
  0x48   :  { %172 = dma.done.wait [#allocation9], 32  }
  0x49   :  { %173 = vsyncadd [#allocation9], 4294967264 }
  0x4a   :  { %70 = vsyncpa [#allocation3], 1 }
  0x4b   :  { %71 = vsyncpa [#allocation6], 1 }
  0x4c   :  { %72 = vsyncpa [#allocation4], 1 }
  0x4d   :  { %73 = vsyncpa [#allocation9], 1 }

</bundles_post_ra>
